<compile_context>
chip_gen: v7x
topology: tpu7x:2x2x1
jax: 0.10.0
libtpu: 0.0.40
codegen_flags: <defaults>
</compile_context>

<pallas_src>
import jax
import jax.numpy as jnp
import numpy as np
from jax.experimental import pallas as pl
from jax.experimental.pallas import tpu as pltpu


def _make_kernel(has_mask: bool, emit_preds: bool, has_tail: bool,
                 T_total: int, TT: int):
    """Kernel variant factory.  Ref order: inputs, outputs, scratch."""

    def kernel(*refs):
        i = 0
        x_ref = refs[i]; i += 1            # (TT, H)   input dtype
        w_ref = refs[i]; i += 1            # (H, O)    input dtype
        b_ref = refs[i]; i += 1            # (1, O)    f32
        labels_ref = refs[i]; i += 1       # (TT, O)
        if has_mask:
            mask_ref = refs[i]; i += 1     # (TT, Om)  Om in {1, O}
        if emit_preds:
            preds_ref = refs[i]; i += 1    # (TT, O)
        loss_ref = refs[i]; i += 1         # (1, O)    f32
        num_acc = refs[i]; i += 1          # (1, O)    f32 scratch
        if has_mask:
            den_acc = refs[i]; i += 1      # (1, Om)   f32 scratch

        t = pl.program_id(1)

        # Linear: (TT, H) @ (H, O) + b, accumulated in f32 on the MXU.
        preds = jnp.dot(x_ref[...], w_ref[...],
                        preferred_element_type=jnp.float32) + b_ref[...]
        if emit_preds:
            preds_ref[...] = preds.astype(preds_ref.dtype)

        err = preds - labels_ref[...].astype(jnp.float32)
        se = err * err                     # MSELoss(reduction='none'), f32

        if has_tail:
            # Zero out rows past the true sequence length (OOB block padding
            # is undefined; use where so even NaN/Inf garbage cannot leak).
            rows = jax.lax.broadcasted_iota(jnp.int32, (TT, 1), 0)
            valid = (t * TT + rows) < T_total          # (TT, 1) bool
            se = jnp.where(valid, se, 0.0)

        @pl.when(t == 0)
        def _init():
            num_acc[...] = jnp.zeros_like(num_acc)
            if has_mask:
                den_acc[...] = jnp.zeros_like(den_acc)

        if has_mask:
            m = mask_ref[...].astype(jnp.float32)      # (TT, Om)
            if has_tail:
                m = jnp.where(valid, m, 0.0)
            num_acc[...] += jnp.sum(m * se, axis=0, keepdims=True)   # (1, O)
            den_acc[...] += jnp.sum(m, axis=0, keepdims=True)        # (1, Om)
        else:
            num_acc[...] += jnp.sum(se, axis=0, keepdims=True)

        @pl.when(t == pl.num_programs(1) - 1)
        def _finalize():
            if has_mask:
                # per-(b, o) ratio; host just takes the mean over (B, O).
                # NOTE: a (b,o) slot whose mask sums to 0 gives 0/0 = NaN,
                # which matches the PyTorch reference.
                loss_ref[...] = num_acc[...] / den_acc[...]
            else:
                # per-(b, o) SSE over the sequence; host divides by B*T*O.
                loss_ref[...] = num_acc[...]

    return kernel


def _lane_pad(n):
    return ((int(n) + 127) // 128) * 128


def _pick_tile_rows(T, row_bytes, budget, cap=4096):
    """Largest multiple-of-8 row count under the cap/VMEM budget.

    Never requires TT to divide T: the caller uses a cdiv grid and the kernel
    masks the tail rows of the last tile.
    """
    limit = min(int(cap), int(budget) // max(int(row_bytes), 1))
    limit = max(8, (limit // 8) * 8)
    if T <= limit:
        return int(T)          # single full-sequence tile (block == full dim)
    return int(limit)


def regression_head_forward(x, weight, bias, labels, mask=None,
                            return_pred=False, tile_rows=None):
    """x: (B,T,H); weight: (O,H) torch layout; bias: (O,);
    labels: (B,T,O); mask: optional, shape (B,T), (B,T,1) or (B,T,O)."""
    x = jnp.asarray(x)
    labels = jnp.asarray(labels)
    B, T, H = x.shape
    O = int(weight.shape[0])
    has_mask = mask is not None

    in_dtype = x.dtype
    # NOTE: weight is cast to the streaming dtype of x (bf16 inputs stream a
    # bf16 weight; accumulation is still f32 on the MXU).
    w = jnp.asarray(weight).astype(in_dtype).T          # (H, O)
    b = jnp.asarray(bias, jnp.float32).reshape(1, O)    # (1, O)

    if has_mask:
        mask = jnp.asarray(mask)
        if mask.dtype == jnp.bool_:
            mask = mask.astype(jnp.float32)   # avoid packed sub-byte streams
        if mask.ndim == 2:                    # (B, T) per-token mask
            mask = mask[:, :, None]
        Om = int(mask.shape[-1])              # 1 (per-token) or O (full)
        assert mask.shape[0] == B and mask.shape[1] == T and Om in (1, O)
    else:
        Om = 0

    isz = jnp.dtype(in_dtype).itemsize
    lsz = jnp.dtype(labels.dtype).itemsize

    # ---- generation-aware VMEM budget -------------------------------------
    try:
        vmem_cap = int(pltpu.get_tpu_info().vmem_capacity_bytes)
    except Exception:
        vmem_cap = 64 << 20                   # conservative (v7x per-core)
    vmem_limit = max(min(int(vmem_cap * 0.75), 112 << 20), 32 << 20)

    # Per-row VMEM bytes for the streamed (double-buffered) blocks, with the
    # last dim lane-padded to 128.
    row_bytes = _lane_pad(H) * isz + _lane_pad(O) * lsz
    if has_mask:
        row_bytes += _lane_pad(Om) * jnp.dtype(mask.dtype).itemsize
    if return_pred:
        row_bytes += _lane_pad(O) * isz
    row_bytes *= 2                            # double-buffer factor (once!)

    # Resident blocks: weight + bias (double-buffered), f32 scratch, headroom.
    resident = (2 * H * _lane_pad(O) * isz
                + 2 * 8 * _lane_pad(O) * 4          # bias
                + 2 * 8 * _lane_pad(O) * 4          # scratch accumulators
                + (2 << 20))                        # headroom
    tile_budget = max(vmem_limit - resident, 1 << 20)

    TT = _pick_tile_rows(T, row_bytes, tile_budget,
                         cap=(tile_rows if tile_rows else 4096))
    nT = -(-T // TT)                          # cdiv
    has_tail = (T % TT) != 0

    # ---- specs -------------------------------------------------------------
    in_specs = [
        pl.BlockSpec((None, TT, H), lambda bb, tt: (bb, tt, 0)),   # x      -> (TT, H)
        pl.BlockSpec((H, O), lambda bb, tt: (0, 0)),               # W      -> (H, O)
        pl.BlockSpec((1, O), lambda bb, tt: (0, 0)),               # bias   -> (1, O)
        pl.BlockSpec((None, TT, O), lambda bb, tt: (bb, tt, 0)),   # labels -> (TT, O)
    ]
    inputs = [x, w, b, labels]
    if has_mask:
        in_specs.append(pl.BlockSpec((None, TT, Om), lambda bb, tt: (bb, tt, 0)))
        inputs.append(mask)

    out_shapes = []
    out_specs = []
    if return_pred:
        out_shapes.append(jax.ShapeDtypeStruct((B, T, O), in_dtype))
        out_specs.append(pl.BlockSpec((None, TT, O), lambda bb, tt: (bb, tt, 0)))
    out_shapes.append(jax.ShapeDtypeStruct((B, 1, O), jnp.float32))  # per-(b,o)
    out_specs.append(pl.BlockSpec((None, 1, O), lambda bb, tt: (bb, 0, 0)))

    scratch_shapes = [pltpu.VMEM((1, O), jnp.float32)]      # numerator / SSE
    if has_mask:
        scratch_shapes.append(pltpu.VMEM((1, Om), jnp.float32))  # denominator

    grid_spec = pltpu.PrefetchScalarGridSpec(
        num_scalar_prefetch=0,
        grid=(B, nT),
        in_specs=in_specs,
        out_specs=out_specs,
        scratch_shapes=scratch_shapes,
    )

    # ---- cost / compiler hints ---------------------------------------------
    mask_bytes = (mask.size * jnp.dtype(mask.dtype).itemsize) if has_mask else 0
    bytes_accessed = (x.size * isz + w.size * isz + O * 4
                      + labels.size * lsz + mask_bytes
                      + (B * T * O * isz if return_pred else 0)
                      + B * O * 4)
    cost = pl.CostEstimate(flops=2 * B * T * H * O + 4 * B * T * O,
                           transcendentals=0,
                           bytes_accessed=int(bytes_accessed))

    compiler_params = pltpu.CompilerParams(
        dimension_semantics=("parallel", "arbitrary"),
        vmem_limit_bytes=int(vmem_limit),
    )

    outs = pl.pallas_call(
        _make_kernel(has_mask, return_pred, has_tail, T, TT),
        out_shape=tuple(out_shapes),
        grid_spec=grid_spec,
        compiler_params=compiler_params,
        cost_estimate=cost,
    )(*inputs)

    if return_pred:
        preds, loss_bo = outs
    else:
        (loss_bo,) = outs

    loss_bo = loss_bo[:, 0, :]                     # (B, O)
    if has_mask:
        loss = jnp.mean(loss_bo)                   # mean over (B, O) of ratios
    else:
        loss = jnp.sum(loss_bo) / (B * T * O)      # global mean squared error

    if return_pred:
        return loss, preds
    return loss


def _reference_forward(x, weight, bias, labels, mask=None):
    preds = jnp.einsum("bth,oh->bto", x, weight) + bias
    se = (preds - labels) ** 2
    if mask is not None:
        loss = jnp.mean(jnp.sum(mask * se, axis=1) / jnp.sum(mask, axis=1))
    else:
        loss = jnp.mean(se)
    return loss, preds


if __name__ == "__main__":
    key = jax.random.PRNGKey(0)
    kx, kl, km, kw, kb, km2 = jax.random.split(key, 6)

    # Small, deterministic shapes.  T=200 is deliberately NOT a multiple of
    # the forced tile (64) so the cdiv-grid + tail-mask path is exercised.
    B, T, H, O = 2, 200, 64, 8
    x = jax.random.normal(kx, (B, T, H), dtype=jnp.float32)
    labels = jax.random.normal(kl, (B, T, O), dtype=jnp.float32)
    weight = jax.random.normal(kw, (O, H), dtype=jnp.float32) / jnp.sqrt(H)
    bias = jax.random.normal(kb, (O,), dtype=jnp.float32) * 0.1

    # ---- Case 1: per-token mask (B,T,1), tiled seq axis with tail, preds ---
    mask_tok = (jax.random.uniform(km, (B, T, 1)) > 0.4).astype(jnp.float32)
    mask_tok = mask_tok.at[:, 0, :].set(1.0)   # guarantee nonzero denominators
    loss_m, preds_m = regression_head_forward(x, weight, bias, labels,
                                              mask=mask_tok, return_pred=True,
                                              tile_rows=64)
    jax.block_until_ready((loss_m, preds_m))
    ref_loss_m, ref_preds = _reference_forward(x, weight, bias, labels,
                                               mask=mask_tok)
    np.testing.assert_allclose(np.asarray(preds_m), np.asarray(ref_preds),
                               rtol=1e-5, atol=1e-5)
    np.testing.assert_allclose(np.asarray(loss_m), np.asarray(ref_loss_m),
                               rtol=1e-5, atol=1e-5)

    # ---- Case 2: full (B,T,O) mask, single full-sequence tile --------------
    mask_full = (jax.random.uniform(km2, (B, T, O)) > 0.4).astype(jnp.float32)
    mask_full = mask_full.at[:, 0, :].set(1.0)
    loss_f = regression_head_forward(x, weight, bias, labels, mask=mask_full)
    jax.block_until_ready(loss_f)
    ref_loss_f, _ = _reference_forward(x, weight, bias, labels, mask=mask_full)
    np.testing.assert_allclose(np.asarray(loss_f), np.asarray(ref_loss_f),
                               rtol=1e-5, atol=1e-5)

    # ---- Case 3: unmasked specialization, loss only (with tail tiles) ------
    loss_u = regression_head_forward(x, weight, bias, labels, mask=None,
                                     tile_rows=64)
    jax.block_until_ready(loss_u)
    ref_loss_u, _ = _reference_forward(x, weight, bias, labels, mask=None)
    np.testing.assert_allclose(np.asarray(loss_u), np.asarray(ref_loss_u),
                               rtol=1e-5, atol=1e-5)

    # ---- Case 4: bf16 streaming smoke test (loose tolerance) ---------------
    loss_bf = regression_head_forward(x.astype(jnp.bfloat16), weight, bias,
                                      labels.astype(jnp.bfloat16),
                                      mask=mask_tok, tile_rows=64)
    jax.block_until_ready(loss_bf)
    np.testing.assert_allclose(np.asarray(loss_bf, dtype=np.float32),
                               np.asarray(ref_loss_m), rtol=1e-1, atol=1e-1)

    print("KERNEL_OK")
</pallas_src>

<mosaic_0001>
module attributes {stable_mosaic.version = 11 : i64} {
  func.func @kernel(%arg0: i32, %arg1: i32, %arg2: memref<1x64x64xf32, #tpu.memory_space<vmem>>, %arg3: memref<64x8xf32, #tpu.memory_space<vmem>>, %arg4: memref<1x8xf32, #tpu.memory_space<vmem>>, %arg5: memref<1x64x8xf32, #tpu.memory_space<vmem>>, %arg6: memref<1x64x1xf32, #tpu.memory_space<vmem>>, %arg7: memref<1x64x8xf32, #tpu.memory_space<vmem>>, %arg8: memref<1x1x8xf32, #tpu.memory_space<vmem>>, %arg9: memref<1x8xf32, #tpu.memory_space<vmem>>, %arg10: memref<1x1xf32, #tpu.memory_space<vmem>>) attributes {dimension_semantics = [#tpu.dimension_semantics<parallel>, #tpu.dimension_semantics<arbitrary>], iteration_bounds = array<i64: 2, 4>, scalar_prefetch = 0 : i64, scratch_operands = 2 : i64, tpu.core_type = #tpu.core_type<tc>, window_params = [{transform_indices = @transform_0, window_bounds = array<i64: 1, 64, 64>}, {pipeline_mode = #tpu.pipeline_mode<synchronous>, transform_indices = @transform_1, window_bounds = array<i64: 64, 8>}, {pipeline_mode = #tpu.pipeline_mode<synchronous>, transform_indices = @transform_2, window_bounds = array<i64: 1, 8>}, {transform_indices = @transform_3, window_bounds = array<i64: 1, 64, 8>}, {transform_indices = @transform_4, window_bounds = array<i64: 1, 64, 1>}, {transform_indices = @transform_5, window_bounds = array<i64: 1, 64, 8>}, {transform_indices = @transform_6, window_bounds = array<i64: 1, 1, 8>}]} {
    %c0 = arith.constant 0 : index
    %c0_0 = arith.constant 0 : index
    %c0_1 = arith.constant 0 : index
    %0 = vector.load %arg2[%c0, %c0_0, %c0_1] : memref<1x64x64xf32, #tpu.memory_space<vmem>>, vector<1x64x64xf32>
    %1 = vector.shape_cast %0 : vector<1x64x64xf32> to vector<64x64xf32>
    %c0_2 = arith.constant 0 : index
    %c0_3 = arith.constant 0 : index
    %2 = vector.load %arg3[%c0_2, %c0_3] : memref<64x8xf32, #tpu.memory_space<vmem>>, vector<64x8xf32>
    %cst = arith.constant dense<0.000000e+00> : vector<64x8xf32>
    %3 = tpu.matmul %1, %2, %cst {dimension_numbers = #tpu.dot_dimension_numbers<[1], [0], [0], [1], [0, 0, 1, 1], [], []>} : vector<64x64xf32>, vector<64x8xf32>, vector<64x8xf32> -> vector<64x8xf32>
    %c0_4 = arith.constant 0 : index
    %c0_5 = arith.constant 0 : index
    %4 = vector.load %arg4[%c0_4, %c0_5] : memref<1x8xf32, #tpu.memory_space<vmem>>, vector<1x8xf32>
    %5 = vector.broadcast %4 : vector<1x8xf32> to vector<64x8xf32>
    %6 = arith.addf %3, %5 : vector<64x8xf32>
    %c0_6 = arith.constant 0 : index
    %c0_7 = arith.constant 0 : index
    %c0_8 = arith.constant 0 : index
    %7 = vector.load %arg7[%c0_6, %c0_7, %c0_8] : memref<1x64x8xf32, #tpu.memory_space<vmem>>, vector<1x64x8xf32>
    %8 = vector.shape_cast %7 : vector<1x64x8xf32> to vector<64x8xf32>
    %9 = vector.shape_cast %6 : vector<64x8xf32> to vector<1x64x8xf32>
    tpu.vector_store %arg7[%c0_6, %c0_7, %c0_8], %9 {strides = array<i32>} : memref<1x64x8xf32, #tpu.memory_space<vmem>>, vector<1x64x8xf32>,
    %c0_9 = arith.constant 0 : index
    %c0_10 = arith.constant 0 : index
    %c0_11 = arith.constant 0 : index
    %10 = vector.load %arg5[%c0_9, %c0_10, %c0_11] : memref<1x64x8xf32, #tpu.memory_space<vmem>>, vector<1x64x8xf32>
    %11 = vector.shape_cast %10 : vector<1x64x8xf32> to vector<64x8xf32>
    %12 = arith.subf %6, %11 : vector<64x8xf32>
    %13 = arith.mulf %12, %12 : vector<64x8xf32>
    %14 = tpu.iota {dimensions = array<i32: 0>} : vector<64x1xi32>
    %c64_i32 = arith.constant 64 : i32
    %15 = arith.muli %arg1, %c64_i32 : i32
    %16 = vector.broadcast %15 : i32 to vector<64x1xi32>
    %17 = arith.addi %16, %14 : vector<64x1xi32>
    %c200_i32 = arith.constant 200 : i32
    %18 = vector.broadcast %c200_i32 : i32 to vector<64x1xi32>
    %19 = arith.cmpi slt, %17, %18 : vector<64x1xi32>
    %cst_12 = arith.constant 0.000000e+00 : f32
    %20 = vector.shape_cast %19 : vector<64x1xi1> to vector<64x1xi1>
    %21 = vector.broadcast %20 : vector<64x1xi1> to vector<64x8xi1>
    %22 = vector.broadcast %cst_12 : f32 to vector<64x8xf32>
    %23 = arith.select %21, %13, %22 : vector<64x8xi1>, vector<64x8xf32>
    %c0_i32 = arith.constant 0 : i32
    %24 = arith.cmpi eq, %arg1, %c0_i32 : i32
    %25 = arith.extui %24 : i1 to i32
    %c0_i32_13 = arith.constant 0 : i32
    %26 = arith.cmpi ne, %25, %c0_i32_13 : i32
    scf.if %26 {
      %cst_29 = arith.constant 0.000000e+00 : f32
      %46 = vector.broadcast %cst_29 : f32 to vector<1x8xf32>
      %c0_30 = arith.constant 0 : index
      %c0_31 = arith.constant 0 : index
      %47 = vector.load %arg9[%c0_30, %c0_31] : memref<1x8xf32, #tpu.memory_space<vmem>>, vector<1x8xf32>
      tpu.vector_store %arg9[%c0_30, %c0_31], %46 {strides = array<i32>} : memref<1x8xf32, #tpu.memory_space<vmem>>, vector<1x8xf32>,
      %cst_32 = arith.constant 0.000000e+00 : f32
      %48 = vector.broadcast %cst_32 : f32 to vector<1x1xf32>
      %c0_33 = arith.constant 0 : index
      %c0_34 = arith.constant 0 : index
      %49 = vector.load %arg10[%c0_33, %c0_34] : memref<1x1xf32, #tpu.memory_space<vmem>>, vector<1x1xf32>
      tpu.vector_store %arg10[%c0_33, %c0_34], %48 {strides = array<i32>} : memref<1x1xf32, #tpu.memory_space<vmem>>, vector<1x1xf32>,
    } else {
    }
    %c0_14 = arith.constant 0 : index
    %c0_15 = arith.constant 0 : index
    %c0_16 = arith.constant 0 : index
    %27 = vector.load %arg6[%c0_14, %c0_15, %c0_16] : memref<1x64x1xf32, #tpu.memory_space<vmem>>, vector<1x64x1xf32>
    %28 = vector.shape_cast %27 : vector<1x64x1xf32> to vector<64x1xf32>
    %cst_17 = arith.constant 0.000000e+00 : f32
    %29 = vector.broadcast %cst_17 : f32 to vector<64x1xf32>
    %30 = arith.select %19, %28, %29 : vector<64x1xi1>, vector<64x1xf32>
    %c0_18 = arith.constant 0 : index
    %c0_19 = arith.constant 0 : index
    %31 = vector.load %arg9[%c0_18, %c0_19] : memref<1x8xf32, #tpu.memory_space<vmem>>, vector<1x8xf32>
    %32 = vector.broadcast %30 : vector<64x1xf32> to vector<64x8xf32>
    %33 = arith.mulf %32, %23 : vector<64x8xf32>
    %cst_20 = arith.constant dense<0.000000e+00> : vector<8xf32>
    %34 = vector.multi_reduction <add>, %33, %cst_20 [0] : vector<64x8xf32> to vector<8xf32>
    %35 = vector.shape_cast %34 : vector<8xf32> to vector<1x8xf32>
    %36 = arith.addf %31, %35 : vector<1x8xf32>
    %c0_21 = arith.constant 0 : index
    %c0_22 = arith.constant 0 : index
    %37 = vector.load %arg9[%c0_21, %c0_22] : memref<1x8xf32, #tpu.memory_space<vmem>>, vector<1x8xf32>
    tpu.vector_store %arg9[%c0_21, %c0_22], %36 {strides = array<i32>} : memref<1x8xf32, #tpu.memory_space<vmem>>, vector<1x8xf32>,
    %c0_23 = arith.constant 0 : index
    %c0_24 = arith.constant 0 : index
    %38 = vector.load %arg10[%c0_23, %c0_24] : memref<1x1xf32, #tpu.memory_space<vmem>>, vector<1x1xf32>
    %cst_25 = arith.constant dense<0.000000e+00> : vector<1xf32>
    %39 = vector.multi_reduction <add>, %30, %cst_25 [0] : vector<64x1xf32> to vector<1xf32>
    %40 = vector.shape_cast %39 : vector<1xf32> to vector<1x1xf32>
    %41 = arith.addf %38, %40 : vector<1x1xf32>
    %c0_26 = arith.constant 0 : index
    %c0_27 = arith.constant 0 : index
    %42 = vector.load %arg10[%c0_26, %c0_27] : memref<1x1xf32, #tpu.memory_space<vmem>>, vector<1x1xf32>
    tpu.vector_store %arg10[%c0_26, %c0_27], %41 {strides = array<i32>} : memref<1x1xf32, #tpu.memory_space<vmem>>, vector<1x1xf32>,
    %c3_i32 = arith.constant 3 : i32
    %43 = arith.cmpi eq, %arg1, %c3_i32 : i32
    %44 = arith.extui %43 : i1 to i32
    %c0_i32_28 = arith.constant 0 : i32
    %45 = arith.cmpi ne, %44, %c0_i32_28 : i32
    scf.if %45 {
      %c0_29 = arith.constant 0 : index
      %c0_30 = arith.constant 0 : index
      %46 = vector.load %arg9[%c0_29, %c0_30] : memref<1x8xf32, #tpu.memory_space<vmem>>, vector<1x8xf32>
      %c0_31 = arith.constant 0 : index
      %c0_32 = arith.constant 0 : index
      %47 = vector.load %arg10[%c0_31, %c0_32] : memref<1x1xf32, #tpu.memory_space<vmem>>, vector<1x1xf32>
      %48 = vector.broadcast %47 : vector<1x1xf32> to vector<1x8xf32>
      %49 = arith.divf %46, %48 : vector<1x8xf32>
      %c0_33 = arith.constant 0 : index
      %c0_34 = arith.constant 0 : index
      %c0_35 = arith.constant 0 : index
      %50 = vector.load %arg8[%c0_33, %c0_34, %c0_35] : memref<1x1x8xf32, #tpu.memory_space<vmem>>, vector<1x1x8xf32>
      %51 = vector.shape_cast %50 : vector<1x1x8xf32> to vector<1x8xf32>
      %52 = vector.shape_cast %49 : vector<1x8xf32> to vector<1x1x8xf32>
      tpu.vector_store %arg8[%c0_33, %c0_34, %c0_35], %52 {strides = array<i32>} : memref<1x1x8xf32, #tpu.memory_space<vmem>>, vector<1x1x8xf32>,
    } else {
    }
    return
  }
  func.func @transform_0(%arg0: i32, %arg1: i32) -> (i32, i32, i32) {
    %c0_i32 = arith.constant 0 : i32
    %c0_i32_0 = arith.constant 0 : i32
    return %arg0, %arg1, %c0_i32 : i32, i32, i32
  }
  func.func @transform_1(%arg0: i32, %arg1: i32) -> (i32, i32) {
    %c0_i32 = arith.constant 0 : i32
    %c0_i32_0 = arith.constant 0 : i32
    %c0_i32_1 = arith.constant 0 : i32
    return %c0_i32, %c0_i32_0 : i32, i32
  }
  func.func @transform_2(%arg0: i32, %arg1: i32) -> (i32, i32) {
    %c0_i32 = arith.constant 0 : i32
    %c0_i32_0 = arith.constant 0 : i32
    %c0_i32_1 = arith.constant 0 : i32
    return %c0_i32, %c0_i32_0 : i32, i32
  }
  func.func @transform_3(%arg0: i32, %arg1: i32) -> (i32, i32, i32) {
    %c0_i32 = arith.constant 0 : i32
    %c0_i32_0 = arith.constant 0 : i32
    return %arg0, %arg1, %c0_i32 : i32, i32, i32
  }
  func.func @transform_4(%arg0: i32, %arg1: i32) -> (i32, i32, i32) {
    %c0_i32 = arith.constant 0 : i32
    %c0_i32_0 = arith.constant 0 : i32
    return %arg0, %arg1, %c0_i32 : i32, i32, i32
  }
  func.func @transform_5(%arg0: i32, %arg1: i32) -> (i32, i32, i32) {
    %c0_i32 = arith.constant 0 : i32
    %c0_i32_0 = arith.constant 0 : i32
    return %arg0, %arg1, %c0_i32 : i32, i32, i32
  }
  func.func @transform_6(%arg0: i32, %arg1: i32) -> (i32, i32, i32) {
    %c0_i32 = arith.constant 0 : i32
    %c0_i32_0 = arith.constant 0 : i32
    %c0_i32_1 = arith.constant 0 : i32
    return %arg0, %c0_i32, %c0_i32_0 : i32, i32, i32
  }
}

</mosaic_0001>

<bundles_post_ra>
// kernel: tpu_custom_call.1
= control target key start
LH: loop header
LB: loop body
LE: loop exit
PB: predicated region body
PF: predicated region fallthrough
CT: control target
= control target key end

     0   :  { %s2047_s0 = inlined_call_operand.vmem [shape: f32[2,200,64], index: 0, kind: input, shape index: {}]   ;;  %s2048_s1 = inlined_call_operand.vmem [shape: f32[64,8], index: 1, kind: input, shape index: {}]   ;;  %s2049_s2 = inlined_call_operand.vmem [shape: f32[1,8], index: 2, kind: input, shape index: {}]   ;;  %s2050_s3 = inlined_call_operand.vmem [shape: f32[2,200,8], index: 3, kind: input, shape index: {}]   ;;  %s2051_s4 = inlined_call_operand.vmem [shape: f32[2,200,1], index: 4, kind: input, shape index: {}]   ;;  %s2052_s5 = inlined_call_operand.vmem [shape: f32[2,200,8], index: 5, kind: output, shape index: {0}]   ;;  %s2053_s6 = inlined_call_operand.hbm [shape: f32[2,1,8], index: 6, kind: output, shape index: {1}]  }
   0x1   :  { %2058 = sst [smem:[#allocation13_spill]] %s2047_s0 }
   0x2   :  { %2059 = sst [smem:[#allocation14_spill]] %s2048_s1 }
   0x3   :  { %2060 = sst [smem:[#allocation15_spill]] %s2049_s2 }
   0x4   :  { %12 = vsyncpa [#allocation6], 0 }
   0x5   :  { %14 = vsyncpa [#allocation6 + $0x1], 0  ;;  %s1635_s21 = smov 0   ;;  %s1637_s22 = smov 0  }
   0x6   :  { %s1639_s23 = smov 0   ;;  %s1641_s24 = smov 0  }
   0x7   :  { %s1643_s25 = smov 0   ;;  %s1645_s26 = smov 0  }
   0x8   :  { %s1647_s27 = smov 0   ;;  %s1649_s28 = smov 0  }
   0x9   :  { %s1651_s29 = smov 0   ;;  %s1653_s30 = smov 0  }
   0xa LB: > { %2061 = sst [smem:[#allocation8_spill]] %s1554_s28  ;;  %s1147_s7 = sadd.s32 4294967295, %s1562_s30   ;;  %s1562_s30 = sphi %s1653_s30, %s20_s30   ;;  %s1558_s29 = sphi %s1651_s29, %s2081_s29   ;;  %s1554_s28 = sphi %s1649_s28, %s2080_s28   ;;  %s1550_s27 = sphi %s1647_s27, %s2079_s27   ;;  %s1546_s26 = sphi %s1645_s26, %s2078_s26   ;;  %s1542_s25 = sphi %s1643_s25, %s2086_s25   ;;  %s1538_s24 = sphi %s1641_s24, %s2085_s24   ;;  %s1534_s23 = sphi %s1639_s23, %s2084_s23   ;;  %s1530_s22 = sphi %s1637_s22, %s2083_s22   ;;  %s1526_s21 = sphi %s1635_s21, %s2082_s21  }
   0xb   : > { %2062 = sst [smem:[#allocation9_spill]] %s1558_s29  ;;  %s1148_s8 = sadd.s32 4294967294, %s1562_s30  }
   0xc   : > { %s29_s9 = sadd.s32 1, %s1554_s28  ;;  %s32_s10 = sadd.s32 1, %s1558_s29 }
   0xd   : > { %p30_p0 = scmp.ge.s32.totalorder %s29_s9, 4  ;;  %s167_s11 = sadd.s32 1, %s1542_s25 }
   0xe   : > { %p177_p1 = scmp.ne.s32.totalorder %s1542_s25, %s1538_s24  ;;  %p178_p2 = scmp.eq.s32.totalorder %s1147_s7, 7 }
   0xf   : > { %s2088_s9 = smov (%p30_p0, %s29_s9), 0  ;;  %s2090_s10 = smov (!%p30_p0, %s32_s10), %s1558_s29 }
  0x10   : > { %2063 = sst [smem:[#allocation10_spill]] %s2088_s9  ;;  %s163_s12 = ssub.s32 %s1554_s28, %s2088_s9 }
  0x11   : > { %p1697_p3 = por %p178_p2, %p177_p1  ;;  %p34_p4 = scmp.ge.s32.totalorder %s2090_s10, 2 }
  0x12   : > { %s193_s14 = sadd.s32 1, %s1534_s23  ;;  %p203_p5 = scmp.ne.s32.totalorder %s1534_s23, %s1530_s22 }
  0x13   : > { %p209_p6 = scmp.ne.s32.totalorder %s1530_s22, %s1526_s21  ;;  %s2092_s10 = smov (%p34_p4, %s2090_s10), 0 }
  0x14   : > { %2065 = sst [smem:[#allocation11_spill]] %s2092_s10  ;;  %p1708_p7 = por %p203_p5, %p178_p2 }
  0x15   : > { %p210_p8 = scmp.eq.s32.totalorder %s1148_s8, 7  ;;  %s162_s16 = ssub.s32 %s1558_s29, %s2092_s10 }
  0x16   : > { %p1151_p9 = scmp.ge.s32.totalorder %s1562_s30, 1  ;;  %s164_s17 = sor.u32 %s163_s12, %s162_s16 }
  0x17   : > { %p191_p10 = scmp.eq.s32.totalorder %s162_s16, 0  ;;  %p165_p11 = scmp.eq.s32.totalorder %s164_s17, 0 }
  0x18   : > { %p1715_p12 = por %p210_p8, %p209_p6  ;;  %p297_p13 = scmp.lt.s32.totalorder %s1562_s30, 9 }
  0x19   : > { %s1720_s19 = scalar_select %p191_p10, %s1534_s23, %s193_s14  }
  0x1a   : > { %s1723_s20 = scalar_select %p165_p11, %s1542_s25, %s167_s11  }
  0x1b   : > { %p298_p0 = pnand %p1151_p9, %p297_p13 }
  0x1c   : > { %2068 = sst [smem:[#allocation12_spill]] %s1723_s20  ;;  %s2069_s1 = sld [smem:[#allocation14_spill]] (!%p298_p0)  ;;  %vm446_vm0 = vcmask (!%p298_p0), 523264   ;;  %v609_v20 = vlaneseq (!%p298_p0)  ;;  %vm576_vm1 = vcmask (!%p298_p0), 64512  }
  0x1d   : > { %301 = sbr.rel (%p298_p0) target bundleno = 644 (0x284), region = 40  ;;  %s1737_s11 = sshll.u32 (!%p298_p0), %s1546_s26, 3 }
  0x1e   : > { %p369_p1 = scmp.lt.s32.totalorder (!%p298_p0), %s1550_s27, 1  ;;  %p371_p2 = scmp.lt.s32.totalorder (!%p298_p0), %s1737_s11, 24  ;;  %v1778_v21 = vshrl.u32 (!%p298_p0), %v609_v20, 7 }
  0x1f   : > { %s2070_s0 = sld [smem:[#allocation13_spill]] (!%p298_p0)  ;;  %s1168_s28 = sshll.u32 (!%p298_p0), %s1546_s26, 6 }
  0x20   : > { %v611_v22 = vadd.s32 (!%p298_p0), 8, %v1778_v21  ;;  %v615_v23 = vadd.s32 (!%p298_p0), 40, %v1778_v21  ;;  %s355_s20 = sand.u32 (!%p298_p0), 1, %s1538_s24   ;;  %v619_v24 = vstv (!%p298_p0), %s1168_s28  ;;  %v614_v25 = vadd.s32 (!%p298_p0), 32, %v1778_v21  ;;  %s2071_s2 = sld [smem:[#allocation15_spill]] (!%p298_p0) }
  0x21   : > { %v613_v26 = vadd.s32 (!%p298_p0), 24, %v1778_v21  ;;  %v617_v27 = vadd.s32 (!%p298_p0), 56, %v1778_v21  ;;  %v1801_v31 = vadd.s32 (!%p298_p0), %v619_v24, %v1778_v21  ;;  %v612_v33 = vadd.s32 (!%p298_p0), 16, %v1778_v21  ;;  %p1169_p4 = scmp.ne.s32.totalorder (!%p298_p0), %s1546_s26, 0 }
  0x22   : > { %v431_v0 = vld [vmem:[%s2069_s1] sm:$0xff] (!%p298_p0)  ;;  %v432_v1 = vld [vmem:[%s2069_s1 + $0x8] sm:$0xff] (!%p298_p0)  ;;  %v433_v2 = vld [vmem:[%s2069_s1 + $0x10] sm:$0xff] (!%p298_p0)  ;;  %v1793_v28 = vadd.s32 (!%p298_p0), %v619_v24, %v611_v22  ;;  %v1795_v29 = vadd.s32 (!%p298_p0), %v619_v24, %v615_v23  ;;  %v1803_v32 = vadd.s32 (!%p298_p0), %v619_v24, %v614_v25  ;;  %v616_v34 = vadd.s32 (!%p298_p0), 48, %v1778_v21 }
  0x23   : > { %v1235_v3 = vpack.c.bf16 (!%p298_p0), %v432_v1, %v431_v0  ;;  %v434_v4 = vld [vmem:[%s2069_s1 + $0x18] sm:$0xff] (!%p298_p0)  ;;  %v435_v6 = vld [vmem:[%s2069_s1 + $0x20] sm:$0xff] (!%p298_p0)  ;;  %v436_v7 = vld [vmem:[%s2069_s1 + $0x28] sm:$0xff] (!%p298_p0)  ;;  %v1809_v39 = vadd.s32 (!%p298_p0), %v619_v24, %v613_v26  ;;  %v1811_v40 = vadd.s32 (!%p298_p0), %v619_v24, %v617_v27  ;;  %vm628_vm4 = vcmp.lt.s32.totalorder (!%p298_p0), %v1801_v31, 200 }
  0x24   : > { %v1239_v5 = vpack.c.bf16 %v434_v4, %v433_v2  ;;  %s370_s10 = scalar_select %p369_p1, %s1550_s27, 1  ;;  %v1243_v8 = vpack.c.bf16 %v436_v7, %v435_v6  ;;  %v437_v9 = vld [vmem:[%s2069_s1 + $0x30] sm:$0xff]  ;;  %v438_v10 = vld [vmem:[%s2069_s1 + $0x38] sm:$0xff]  ;;  %vm629_vm2 = vcmp.lt.s32.totalorder %v1793_v28, 200  ;;  %vm633_vm3 = vcmp.lt.s32.totalorder %v1795_v29, 200 }
  0x25   : > { %1236 = vmatprep.subr.bf16.mxu0 %v1235_v3  ;;  %1251 = vmatprep.subr.bf16.mxu1 %v1235_v3  ;;  %s372_s14 = scalar_select %p371_p2, %s1737_s11, 24  ;;  %v1247_v11 = vpack.c.bf16 %v438_v10, %v437_v9  ;;  %vm632_vm5 = vcmp.lt.s32.totalorder %v1803_v32, 200  ;;  %v1825_v51 = vadd.s32 %v619_v24, %v612_v33  ;;  %v1827_v52 = vadd.s32 %v619_v24, %v616_v34 }
  0x26   : > { %1238 = vmatpush3.bf16.msra.mxu0 %v1235_v3  ;;  %1255 = vmatpush3.bf16.msra.mxu1 %v1235_v3  ;;  %s1259_s29 = smul.u32 25, %s370_s10  ;;  %v1159_v30 = vld [vmem:[%s2071_s2] ss:$0 sm:$0xff]  ;;  %vm631_vm6 = vcmp.lt.s32.totalorder %v1809_v39, 200  ;;  %vm635_vm7 = vcmp.lt.s32.totalorder %v1811_v40, 200  ;;  %vm664_vm10 = vcmask (!%p1169_p4), 57344  }
  0x27   : > { %1240 = vmatprep.subr.bf16.mxu0 %v1239_v5  ;;  %1252 = vmatprep.subr.bf16.mxu1 %v1239_v5  ;;  %vm630_vm8 = vcmp.lt.s32.totalorder %v1825_v51, 200  ;;  %vm634_vm9 = vcmp.lt.s32.totalorder %v1827_v52, 200  ;;  %vm666_vm11 = vcmask (!%p1169_p4), 0   ;;  %v1596_v24 = vmov (!%p1169_p4), 0.0  }
  0x28   : > { %s374_s16 = sadd.s32 %s1259_s29, %s372_s14  ;;  %s1152_s14 = sshll.u32 %s355_s20, 6  ;;  %665 = vst.msk [vmem:[#allocation2] sm:$0x1] (!%p1169_p4), %vm664_vm10, %v1596_v24 }
  0x29   : > { %s1758_s17 = sshll.u32 %s374_s16, 3  ;;  %667 = vst.msk [vmem:[#allocation3] sm:$0x1] (!%p1169_p4), %vm666_vm11, %v1596_v24 }
  0x2a   : > { %1242 = vmatpush3.bf16.msra.mxu0 %v1239_v5  ;;  %1256 = vmatpush3.bf16.msra.mxu1 %v1239_v5  ;;  %s376_s7 = scalar_lea.vmem %s2070_s0, %s1758_s17  ;;  %s1768_s8 = scalar_lea.vmem %s2051_s4, %s1758_s17 }
  0x2b   : > { %1244 = vmatprep.subr.bf16.mxu0 %v1243_v8  ;;  %1253 = vmatprep.subr.bf16.mxu1 %v1243_v8  ;;  %v423_v12 = vld [vmem:[%s376_s7] sm:$0xff]  ;;  %v424_v14 = vld [vmem:[%s376_s7 + $0x8] sm:$0xff]  ;;  %v425_v16 = vld [vmem:[%s376_s7 + $0x10] sm:$0xff]  ;;  %s1791_s16 = scalar_lea.vmem %s2050_s3, %s1758_s17  ;;  %s1819_s17 = scalar_lea.vmem [#allocation4], %s1152_s14  }
  0x2c   : > { %v427_v13 = vld [vmem:[%s376_s7 + $0x20] sm:$0xff]  ;;  %1223 = vmatprep.mubr.msk.f32.mxu0 %vm446_vm0, %v423_v12  ;;  %v428_v15 = vld [vmem:[%s376_s7 + $0x28] sm:$0xff]  ;;  %v429_v17 = vld [vmem:[%s376_s7 + $0x30] sm:$0xff] }
  0x2d   : > { %1229 = vmatprep.mubr.msk.f32.mxu1 %vm446_vm0, %v427_v13  ;;  %v426_v18 = vld [vmem:[%s376_s7 + $0x18] sm:$0xff]  ;;  %v586_v36 = vld [vmem:[%s1791_s16 + $0x8] sm:$0xff]  ;;  %v585_v44 = vld [vmem:[%s1791_s16] sm:$0xff] }
  0x2e   : > { %1246 = vmatpush3.bf16.msra.mxu0 %v1243_v8  ;;  %1257 = vmatpush3.bf16.msra.mxu1 %v1243_v8  ;;  %v430_v19 = vld [vmem:[%s376_s7 + $0x38] sm:$0xff]  ;;  %v590_v38 = vld [vmem:[%s1791_s16 + $0x28] sm:$0xff]  ;;  %v589_v46 = vld [vmem:[%s1791_s16 + $0x20] sm:$0xff]  ;;  %s2072_s7 = sand.u32 1, %s1530_s22  }
  0x2f   : > { %1248 = vmatprep.subr.bf16.mxu0 %v1247_v11  ;;  %1254 = vmatprep.subr.bf16.mxu1 %v1247_v11  ;;  %v588_v56 = vld [vmem:[%s1791_s16 + $0x18] sm:$0xff]  ;;  %v587_v0 = vld [vmem:[%s1791_s16 + $0x10] sm:$0xff]  ;;  %s1883_s9 = scalar_lea.vmem [#allocation5], %s2072_s7 }
  0x30   : > { %v592_v58 = vld [vmem:[%s1791_s16 + $0x38] sm:$0xff]  ;;  %v591_v2 = vld [vmem:[%s1791_s16 + $0x30] sm:$0xff] }
  0x32   : > { %1250 = vmatpush3.bf16.msra.mxu0 %v1247_v11  ;;  %1258 = vmatpush3.bf16.msra.mxu1 %v1247_v11 }
  0x35   : > { %1224 = vmatmul.mubr.msk.f32.vlgmr.msra.gmra.mrb[0].mxu0 %vm446_vm0, %v424_v14  ;;  %1230 = vmatmul.mubr.msk.f32.vlgmr.msra.gmra.mrb[0].mxu1 %vm446_vm0, %v428_v15 }
  0x36   : > { %1226 = vmatprep.mubr.msk.f32.mxu0 %vm446_vm0, %v425_v16  ;;  %1232 = vmatprep.mubr.msk.f32.mxu1 %vm446_vm0, %v429_v17 }
  0x39   : > { %1227 = vmatmul.mubr.msk.f32.gmra.mrb[2].mxu0 %vm446_vm0, %v426_v18  ;;  %1233 = vmatmul.mubr.msk.f32.gmra.mrb[2].mxu1 %vm446_vm0, %v430_v19 }
 0x108   : > { %v1225_v35 = vpop.f32.mrb[0].mxu0  ;;  %v1231_v37 = vpop.f32.mrb[0].mxu1 }
 0x109   : > { %v543_v41 = vadd.f32 %v1225_v35, %v1159_v30  ;;  %v563_v42 = vadd.f32 %v1231_v37, %v1159_v30  ;;  %v537_v43 = vpop.f32.mrb[1].mxu0  ;;  %v557_v45 = vpop.f32.mrb[1].mxu1 }
 0x10a   : > { %v538_v47 = vadd.f32 %v1159_v30, %v537_v43  ;;  %v558_v48 = vadd.f32 %v1159_v30, %v557_v45 }
 0x10b   : > { %578 = vst.msk [vmem:[%s1819_s17 + $0x8] sm:$0xff] %vm576_vm1, %v543_v41  ;;  %v594_v49 = vsub.f32 %v543_v41, %v586_v36  ;;  %582 = vst.msk [vmem:[%s1819_s17 + $0x28] sm:$0xff] %vm576_vm1, %v563_v42  ;;  %v598_v50 = vsub.f32 %v563_v42, %v590_v38 }
 0x10c   : > { %577 = vst.msk [vmem:[%s1819_s17] sm:$0xff] %vm576_vm1, %v538_v47  ;;  %v593_v53 = vsub.f32 %v538_v47, %v585_v44  ;;  %581 = vst.msk [vmem:[%s1819_s17 + $0x20] sm:$0xff] %vm576_vm1, %v558_v48  ;;  %v597_v54 = vsub.f32 %v558_v48, %v589_v46  ;;  %v1228_v55 = vpop.f32.mrb[2].mxu0  ;;  %v1234_v57 = vpop.f32.mrb[2].mxu1 }
 0x10d   : > { %v602_v59 = vmul.f32 %v594_v49, %v594_v49  ;;  %v606_v60 = vmul.f32 %v598_v50, %v598_v50  ;;  %v553_v61 = vadd.f32 %v1228_v55, %v1159_v30  ;;  %v573_v62 = vadd.f32 %v1234_v57, %v1159_v30  ;;  %v547_v63 = vpop.f32.mrb[3].mxu0  ;;  %v567_v1 = vpop.f32.mrb[3].mxu1 }
 0x10e   : > { %v601_v3 = vmul.f32 %v593_v53, %v593_v53  ;;  %v605_v4 = vmul.f32 %v597_v54, %v597_v54  ;;  %v548_v5 = vadd.f32 %v1159_v30, %v547_v63  ;;  %v568_v6 = vadd.f32 %v1159_v30, %v567_v1  ;;  %663 = sbr.rel (%p1169_p4) target bundleno = 277 (0x115), region = 44 }
 0x10f   : > { %v1841_v7 = vsel %vm629_vm2, %v602_v59, 0.0  ;;  %v1845_v8 = vsel %vm633_vm3, %v606_v60, 0.0  ;;  %580 = vst.msk [vmem:[%s1819_s17 + $0x18] sm:$0xff] %vm576_vm1, %v553_v61  ;;  %v596_v9 = vsub.f32 %v553_v61, %v588_v56  ;;  %584 = vst.msk [vmem:[%s1819_s17 + $0x38] sm:$0xff] %vm576_vm1, %v573_v62  ;;  %v600_v10 = vsub.f32 %v573_v62, %v592_v58 }
 0x110   : > { %v1853_v11 = vsel %vm628_vm4, %v601_v3, 0.0  ;;  %v1857_v12 = vsel %vm632_vm5, %v605_v4, 0.0  ;;  %579 = vst.msk [vmem:[%s1819_s17 + $0x10] sm:$0xff] %vm576_vm1, %v548_v5  ;;  %v595_v13 = vsub.f32 %v548_v5, %v587_v0  ;;  %583 = vst.msk [vmem:[%s1819_s17 + $0x30] sm:$0xff] %vm576_vm1, %v568_v6  ;;  %v599_v14 = vsub.f32 %v568_v6, %v591_v2 }
 0x111   : > { %v604_v15 = vmul.f32 %v596_v9, %v596_v9  ;;  %v608_v16 = vmul.f32 %v600_v10, %v600_v10 }
 0x112   : > { %v603_v17 = vmul.f32 %v595_v13, %v595_v13  ;;  %v607_v18 = vmul.f32 %v599_v14, %v599_v14 }
 0x113   : > { %v1867_v19 = vsel %vm631_vm6, %v604_v15, 0.0  ;;  %v1871_v20 = vsel %vm635_vm7, %v608_v16, 0.0 }
 0x114   : > { %v1875_v22 = vsel %vm630_vm8, %v603_v17, 0.0  ;;  %v1879_v23 = vsel %vm634_vm9, %v607_v18, 0.0 }
 0x115 PF: > { %v670_v25 = vld [vmem:[%s1768_s8 + $0x10] sm:$0xff]  ;;  %vm758_vm12 = vcmask 7168   ;;  %v668_v26 = vld [vmem:[%s1768_s8] sm:$0xff]  ;;  %v671_v27 = vld [vmem:[%s1768_s8 + $0x18] sm:$0xff]  ;;  %v1597_v30 = vmov 0   ;;  %vm781_vm13 = vcmask 0  }
 0x116   : > { %1416 = vset.pattern.permute.xlu1 %v1597_v30  ;;  %1415 = vset.pattern.permute.xlu0 %v1597_v30  ;;  %v678_v33 = vsel %vm630_vm8, %v670_v25, 0.0  ;;  %v676_v34 = vsel %vm628_vm4, %v668_v26, 0.0  ;;  %v669_v35 = vld [vmem:[%s1768_s8 + $0x8] sm:$0xff]  ;;  %v679_v41 = vsel %vm631_vm6, %v671_v27, 0.0  ;;  %v672_v43 = vld [vmem:[%s1768_s8 + $0x20] sm:$0xff]  ;;  %v674_v39 = vld [vmem:[%s1768_s8 + $0x30] sm:$0xff] }
 0x117   : > { %697 = vperm.xlu1 %1416, %v678_v33   ;;  %687 = vperm.xlu0 %1415, %v676_v34   ;;  %v759_v36 = vsel %vm758_vm12, %v676_v34, 0.0  ;;  %v677_v37 = vsel %vm629_vm2, %v669_v35, 0.0  ;;  %v762_v38 = vsel %vm758_vm12, %v678_v33, 0.0  ;;  %v673_v44 = vld [vmem:[%s1768_s8 + $0x28] sm:$0xff]  ;;  %v764_v45 = vsel %vm758_vm12, %v679_v41, 0.0  ;;  %v675_v50 = vld [vmem:[%s1768_s8 + $0x38] sm:$0xff] }
 0x118   : > { %v760_v42 = vsel %vm758_vm12, %v677_v37, 0.0  ;;  %v680_v28 = vsel %vm632_vm5, %v672_v43, 0.0  ;;  %v681_v47 = vsel %vm633_vm3, %v673_v44, 0.0  ;;  %v682_v54 = vsel %vm634_vm9, %v674_v39, 0.0  ;;  %v757_v0 = vld [vmem:[#allocation3] sm:$0x1] }
 0x119   : > { %v761_v31 = vadd.f32 %v760_v42, %v759_v36  ;;  %v766_v48 = vsel %vm758_vm12, %v680_v28, 0.0  ;;  %v768_v51 = vsel %vm758_vm12, %v681_v47, 0.0  ;;  %v683_v32 = vsel %vm635_vm7, %v675_v50, 0.0  ;;  %p1170_p5 = scmp.ne.s32.totalorder %s1546_s26, 3 }
 0x11a   : > { %v770_v55 = vsel %vm758_vm12, %v682_v54, 0.0  ;;  %v772_v56 = vsel %vm758_vm12, %v683_v32, 0.0  ;;  %vm755_vm14 = vcmask 57344  }
 0x11b   : > { %702 = vperm.xlu1 %1416, %v679_v41   ;;  %692 = vperm.xlu0 %1415, %v677_v37   ;;  %v763_v46 = vadd.f32 %v762_v38, %v761_v31 }
 0x11d   : > { %v765_v49 = vadd.f32 %v764_v45, %v763_v46  ;;  %v684_v45 = vld [vmem:[#allocation2] sm:$0x1] }
 0x11f   : > { %712 = vperm.xlu1 %1416, %v681_v47   ;;  %707 = vperm.xlu0 %1415, %v680_v28   ;;  %v767_v53 = vadd.f32 %v766_v48, %v765_v49  ;;  %v1598_v28 = vmov (!%p1170_p5), 0   ;;  %v796_v47 = vsub.s32 (!%p1170_p5), 0, %v1778_v21 }
 0x121   : > { %v769_v29 = vadd.f32 %v768_v51, %v767_v53 }
 0x123   : > { %722 = vperm.xlu1 %1416, %v683_v32   ;;  %717 = vperm.xlu0 %1415, %v682_v54   ;;  %v771_v57 = vadd.f32 %v770_v55, %v769_v29 }
 0x125   : > { %v773_v58 = vadd.f32 %v772_v56, %v771_v57 }
 0x127   : > { %v774_v59 = vrot.slane %v773_v58, 4  ;;  %1417 = vset.pattern.permute.xlu0 (!%p1170_p5), %v1598_v28 }
 0x129   : > { %v775_v60 = vadd.f32 %v774_v59, %v773_v58 }
 0x12b   : > { %v776_v61 = vrot.slane %v775_v60, 2 }
 0x12d   : > { %v777_v62 = vadd.f32 %v776_v61, %v775_v60 }
 0x12f   : > { %v778_v63 = vrot.slane %v777_v62, 1 }
 0x131   : > { %v779_v52 = vadd.f32 %v778_v63, %v777_v62 }
 0x133   : > { %v780_v1 = vadd.f32 %v779_v52, %v757_v0 }
 0x135   : > { %782 = vst.msk [vmem:[#allocation3] sm:$0x1] %vm781_vm13, %v780_v1 }
 0x196   : > { %v698_v40 = vpop.permute.xlu1 %697  ;;  %v688_v2 = vpop.permute.xlu0 %687 }
 0x197   : > { %v725_v3 = vmul.f32 %v688_v2, %v1853_v11  ;;  %v727_v6 = vmul.f32 %v698_v40, %v1875_v22 }
 0x199   : > { %v733_v10 = vsel %vm576_vm1, %v725_v3, 0.0  ;;  %v736_v18 = vsel %vm576_vm1, %v727_v6, 0.0 }
 0x19a   : > { %v703_v4 = vpop.permute.xlu1 %702  ;;  %v693_v5 = vpop.permute.xlu0 %692 }
 0x19b   : > { %v726_v9 = vmul.f32 %v693_v5, %v1841_v7  ;;  %v728_v13 = vmul.f32 %v703_v4, %v1867_v19 }
 0x19d   : > { %v734_v14 = vsel %vm576_vm1, %v726_v9, 0.0  ;;  %v738_v25 = vsel %vm576_vm1, %v728_v13, 0.0 }
 0x19e   : > { %v735_v15 = vadd.f32 %v734_v14, %v733_v10  ;;  %v713_v16 = vpop.permute.xlu1 %712  ;;  %v708_v17 = vpop.permute.xlu0 %707 }
 0x19f   : > { %v729_v24 = vmul.f32 %v708_v17, %v1857_v12  ;;  %v730_v22 = vmul.f32 %v713_v16, %v1845_v8 }
 0x1a0   : > { %v737_v11 = vadd.f32 %v736_v18, %v735_v15 }
 0x1a1   : > { %v740_v30 = vsel %vm576_vm1, %v729_v24, 0.0  ;;  %v742_v34 = vsel %vm576_vm1, %v730_v22, 0.0 }
 0x1a2   : > { %v739_v26 = vadd.f32 %v738_v25, %v737_v11  ;;  %v723_v7 = vpop.permute.xlu1 %722  ;;  %v718_v27 = vpop.permute.xlu0 %717 }
 0x1a3   : > { %v731_v19 = vmul.f32 %v718_v27, %v1879_v23  ;;  %v732_v35 = vmul.f32 %v723_v7, %v1871_v20  ;;  %v788_v20 = vld [vmem:[#allocation3] sm:$0x1] (!%p1170_p5) }
 0x1a4   : > { %v741_v33 = vadd.f32 %v740_v30, %v739_v26  ;;  %791 = vperm.xlu0 (!%p1170_p5), %1417, %v788_v20  }
 0x1a5   : > { %v744_v12 = vsel %vm576_vm1, %v731_v19, 0.0  ;;  %v746_v38 = vsel %vm576_vm1, %v732_v35, 0.0 }
 0x1a6   : > { %v743_v36 = vadd.f32 %v742_v34, %v741_v33 }
 0x1a8   : > { %v745_v37 = vadd.f32 %v744_v12, %v743_v36 }
 0x1aa   : > { %v747_v41 = vadd.f32 %v746_v38, %v745_v37 }
 0x1ac   : > { %v748_v8 = vrot.slane %v747_v41, 4 }
 0x1ae   : > { %v749_v42 = vadd.f32 %v748_v8, %v747_v41 }
 0x1b0   : > { %v750_v43 = vrot.slane %v749_v42, 2 }
 0x1b2   : > { %v751_v31 = vadd.f32 %v750_v43, %v749_v42 }
 0x1b4   : > { %v752_v44 = vrot.slane %v751_v31, 1  ;;  %786 = sbr.rel (%p1170_p5) target bundleno = 564 (0x234), region = 48 }
 0x1b6   : > { %v753_v46 = vadd.f32 %v752_v44, %v751_v31 }
 0x1b8   : > { %v754_v23 = vadd.f32 %v753_v46, %v684_v45 }
 0x1ba   : > { %756 = vst.msk [vmem:[#allocation2] sm:$0x1] %vm755_vm14, %v754_v23 }
 0x1c1   : > { %v787_v49 = vld [vmem:[#allocation2] sm:$0x1] }
 0x223   : > { %v792_v48 = vpop.permute.xlu0 %791 }
 0x224   : > { %v797_v39 = vrot.slane %v792_v48, %v796_v47 }
 0x226   : > { %1418 = vrcp.f32 %v797_v39 }
 0x230   : > { %v1419_v50 = vpop.eup %1418 }
 0x231   : > { %v799_v51 = vmul.f32 %v1419_v50, %v787_v49 }
 0x233   : > { %800 = vst.msk [vmem:[%s1883_s9] sm:$0x1] %vm755_vm14, %v799_v51 }
 0x234 PF: > { %s2073_s8 = sand.u32 1, %s1530_s22   ;;  %811 = sbr.rel (!%p1697_p3) target bundleno = 620 (0x26c), region = 52 }
 0x235   : > { %s1941_s26 = scalar_lea.sflag [#allocation6], %s2073_s8  ;;  %s813_s28 = ssub.s32 (%p1697_p3), 25, %s1737_s11 }
 0x236   : > { %s1260_s20 = smul.u32 (%p1697_p3), 25, %s1550_s27  ;;  %p814_p6 = scmp.lt.s32.totalorder (%p1697_p3), %s813_s28, 8 }
 0x238   : > { %s819_s14 = sadd.s32 (%p1697_p3), %s1260_s20, %s1737_s11 }
 0x239   : > { %s1175_s29 = sshll.u32 (%p1697_p3), %s819_s14, 3 }
 0x23a   : > { %s1954_s10 = scalar_lea.vmem (%p1697_p3), %s2052_s5, %s1175_s29  }
 0x23b   : > { %s2094_s28 = smov (!%p814_p6, %s813_s28), 8 }
 0x23c   : > { %s1173_s12 = sshll.u32 %s2094_s28, 7 }
 0x23d   : > { %p1176_p8 = scmp.eq.s32.totalorder %s1173_s12, 0 }
 0x23e   : > { %s1957_s13 = sshrl.u32 (!%p1176_p8), %s2094_s28, 3 }
 0x23f   : > { %824 = sbr.rel (%p1176_p8) target bundleno = 620 (0x26c), region = 56  ;;  %p1177_p3 = scmp.le.s32.totalorder (!%p1176_p8), %s1957_s13, 0 }
 0x246   : > { %1071 = sbr.rel (%p1177_p3) target bundleno = 599 (0x257), region = 155  ;;  %s2074_s11 = smov (!%p1177_p3), %s1954_s10 }
 0x247   : > { %s2075_s7 = smov (!%p1177_p3), %s1819_s17  ;;  %s1966_s8 = smov (!%p1177_p3), 0  }
 0x248   : > { %s1968_s20 = smov (!%p1177_p3), 0  }
 0x24d LB: >> { %v900_v21 = vld [vmem:[%s1570_s7] sm:$0xff]  ;;  %v902_v53 = vld [vmem:[%s1570_s7 + $0x8] sm:$0xff]  ;;  %v904_v54 = vld [vmem:[%s1570_s7 + $0x10] sm:$0xff]  ;;  %s916_s14 = sadd.s32 1, %s1574_s8  ;;  %s894_s20 = sadd.s32 1, %s1578_s20   ;;  %s1578_s20 = sphi %s1968_s20, %s894_s20   ;;  %s1574_s8 = sphi %s1966_s8, %s2076_s8   ;;  %s1570_s7 = sphi %s2075_s7, %s921_s7   ;;  %s1566_s11 = sphi %s2074_s11, %s922_s11  }
 0x24e   : >> { %901 = vst [vmem:[%s1566_s11] sm:$0xff] %v900_v21  ;;  %903 = vst [vmem:[%s1566_s11 + $0x8] sm:$0xff] %v902_v53  ;;  %v906_v32 = vld [vmem:[%s1570_s7 + $0x18] sm:$0xff]  ;;  %v908_v55 = vld [vmem:[%s1570_s7 + $0x20] sm:$0xff]  ;;  %p917_p9 = scmp.ge.s32.totalorder %s916_s14, %s1957_s13  ;;  %p893_p10 = scmp.ge.s32.totalorder %s894_s20, %s1957_s13 }
 0x24f   : >> { %905 = vst [vmem:[%s1566_s11 + $0x10] sm:$0xff] %v904_v54  ;;  %v910_v29 = vld [vmem:[%s1570_s7 + $0x28] sm:$0xff]  ;;  %907 = vst [vmem:[%s1566_s11 + $0x18] sm:$0xff] %v906_v32  ;;  %v912_v56 = vld [vmem:[%s1570_s7 + $0x30] sm:$0xff] }
 0x250   : >> { %909 = vst [vmem:[%s1566_s11 + $0x20] sm:$0xff] %v908_v55  ;;  %911 = vst [vmem:[%s1566_s11 + $0x28] sm:$0xff] %v910_v29  ;;  %v914_v57 = vld [vmem:[%s1570_s7 + $0x38] sm:$0xff]  ;;  %s2096_s14 = smov (%p917_p9, %s916_s14), 0  ;;  %896 = sbr.rel (!%p893_p10) target bundleno = 589 (0x24d), region = 161 }
 0x251   : >> { %913 = vst [vmem:[%s1566_s11 + $0x30] sm:$0xff] %v912_v56  ;;  %915 = vst [vmem:[%s1566_s11 + $0x38] sm:$0xff] %v914_v57  ;;  %s1178_s29 = sshll.u32 %s2096_s14, 6  ;;  %s2076_s8 = smov %s2096_s14 }
 0x252   : >> { %s921_s7 = scalar_lea.vmem %s1819_s17, %s1178_s29 [#allocation4]   ;;  %s922_s11 = scalar_lea.vmem %s1954_s10, %s1178_s29  }
 0x257 PF: > { %s1987_s12 = sand.u32 7, %s2094_s28   ;;  %s1189_s16 = sshll.u32 %s1957_s13, 6 }
 0x258   : > { %s927_s24 = scalar_lea.vmem %s1819_s17, %s1189_s16 [#allocation4]   ;;  %s929_s29 = scalar_lea.vmem %s1954_s10, %s1189_s16  }
 0x259   : > { %p1183_p11 = scmp.le.s32.totalorder %s1987_s12, 0 }
 0x25a   : > { %s1580_s0 = smov (!%p1183_p11), %s929_s29   ;;  %s1584_s1 = smov (!%p1183_p11), %s927_s24  }
 0x25b   : > { %1085 = sbr.rel (%p1183_p11) target bundleno = 620 (0x26c), region = 166  ;;  %s1588_s2 = smov (!%p1183_p11), 0  }
 0x25c   : > { %s1592_s14 = smov (!%p1183_p11), 0  }
 0x262 LB: >> { %v939_v58 = vld [vmem:[%s1586_s1] sm:$0xff]  ;;  %s941_s28 = sadd.s32 1, %s1590_s2  ;;  %s933_s14 = sadd.s32 1, %s1594_s14   ;;  %s1594_s14 = sphi %s1592_s14, %s933_s14   ;;  %s1590_s2 = sphi %s1588_s2, %s1589_s2   ;;  %s1586_s1 = sphi %s1584_s1, %s946_s1   ;;  %s1582_s0 = sphi %s1580_s0, %s947_s0  }
 0x263   : >> { %940 = vst [vmem:[%s1582_s0] sm:$0xff] %v939_v58  ;;  %p942_p13 = scmp.ge.s32.totalorder %s941_s28, %s1987_s12  ;;  %p932_p0 = scmp.ge.s32.totalorder %s933_s14, %s1987_s12 }
 0x265   : >> { %s2098_s28 = smov (%p942_p13, %s941_s28), 0  ;;  %935 = sbr.rel (!%p932_p0) target bundleno = 610 (0x262), region = 172 }
 0x266   : >> { %s1184_s17 = sshll.u32 %s2098_s28, 3  ;;  %s1589_s2 = smov %s2098_s28  }
 0x267   : >> { %s946_s1 = scalar_lea.vmem %s927_s24, %s1184_s17 [#allocation4]   ;;  %s947_s0 = scalar_lea.vmem %s929_s29, %s1184_s17  }
 0x26c PF: > { %s1186_s2 = sshll.u32 %s1550_s27, 4  ;;  %s960_s10 = sshll.u32 %s1883_s9, 4  ;;  %s961_s10 = int_to_ptr.vmem [resolvable:$true] %s960_s10 }
 0x26d   : > { %s958_s7 = scalar_lea.hbm %s2053_s6, %s1186_s2  ;;  %s1420_s8 = scalar_lea.vmem %s961_s10, 16 }
 0x26e   : > { %p1421_p1 = scmp.ne.s32.totalorder %s961_s10, %s1420_s8  ;;  %s1599_s0 = smov [#allocation5]  }
 0x26f   : > { %s1424_s1 = sshll.u32 %s1599_s0, 4  ;;  %s1425_s1 = int_to_ptr.vmem [resolvable:$false] %s1424_s1 }
 0x270   : > { %p1422_p2 = pnand %p1421_p1, %p1708_p7  ;;  %s1426_s20 = scalar_lea.vmem %s1425_s1, 32 }
 0x271   : > { %p1427_p5 = scmp.lt.s32.totalorder %s961_s10, %s1425_s1  ;;  %p1428_p6 = scmp.lt.s32.totalorder %s1426_s20, %s1420_s8 }
 0x272   : > { %p1423_p4 = pneg %p1422_p2 }
 0x273   : > { %p1429_p8 = por %p1428_p6, %p1427_p5 }
 0x275   : > { %p1430_p3 = pnand %p1429_p8, %p1423_p4 }
 0x277   : > { %1433 = shalt.err (!%p1430_p3)
}
 0x278   : > { %s1434_s27 = scalar_lea.hbm %s958_s7, 16  ;;  %s1438_s16 = scalar_lea.hbm %s2053_s6, 32 }
 0x279   : > { %p1435_p9 = scmp.ne.s32.totalorder %s958_s7, %s1434_s27  ;;  %p1439_p13 = scmp.lt.u32.totalorder %s958_s7, %s2053_s6 }
 0x27a   : > { %p1440_p0 = scmp.lt.u32.totalorder %s1438_s16, %s1434_s27  ;;  %p1442_p2 = scmp.lt.u32.totalorder %s1434_s27, %s958_s7 }
 0x27b   : > { %p1436_p10 = pnand %p1435_p9, %p1708_p7 }
 0x27c   : > { %p1441_p1 = por %p1440_p0, %p1439_p13 }
 0x27d   : > { %p1437_p11 = pneg %p1436_p10 }
 0x27e   : > { %p1443_p5 = por %p1442_p2, %p1441_p1 }
 0x280   : > { %p1444_p4 = pnand %p1443_p5, %p1437_p11 }
 0x282   : > { %1447 = shalt.err (!%p1444_p4)
}
 0x283   : > { %1261 = dma.vmem_to_hbm [thread:$0]  (%p1708_p7), %s961_s10, 16, %s958_s7, %s1941_s26  }
 0x284 PF: > { %p1267_p6 = scmp.ge.s32.totalorder %s1562_s30, 2  ;;  %s979_s14 = sand.u32 1, %s1526_s21  }
 0x285   : > { %s980_s28 = scalar_lea.sflag [#allocation6], %s979_s14 }
 0x286   : > { %p1264_p8 = pnand %p1267_p6, %p1715_p12 }
 0x288   : > { %1521 = dma.done.wait (!%p1264_p8), %s980_s28, 16  }
 0x289   : > { %1523 = vsyncadd (!%p1264_p8), %s980_s28, 4294967280  ;;  %s20_s30 = sadd.s32 1, %s1562_s30   ;;  %s2077_s15 = sld [smem:[#allocation12_spill]] }
 0x28a   : > { %p17_p3 = scmp.ge.s32.totalorder %s20_s30, 10   ;;  %s2078_s26 = sld [smem:[#allocation8_spill]] }
 0x28b   : > { %s2079_s27 = sld [smem:[#allocation9_spill]]  ;;  %s2080_s28 = sld [smem:[#allocation10_spill]] }
 0x28c   : > { %s2081_s29 = sld [smem:[#allocation11_spill]]  ;;  %s2082_s21 = smov %s1530_s22 }
 0x28d   : > { %s2083_s22 = smov %s1534_s23  ;;  %s2084_s23 = smov %s1720_s19 }
 0x28e   : > { %s2085_s24 = smov %s1542_s25  ;;  %19 = sbr.rel (!%p17_p3) target bundleno = 10 (0xa), region = 183 }
 0x28f   : > { %s2086_s25 = smov %s2077_s15 }
 0x295   :  { %984 = vsyncpa [#allocation6], 1 }
 0x296   :  { %986 = vsyncpa [#allocation6 + $0x1], 1 }

</bundles_post_ra>
